<compile_context>
chip_gen: v5e
topology: v5e:2x2
jax: 0.10.0
libtpu: 0.0.40
codegen_flags: <defaults>
</compile_context>

<pallas_src>
import jax
import jax.numpy as jnp
from jax import lax
from jax.experimental import pallas as pl
from jax.experimental.pallas import tpu as pltpu

EPS = 1e-5  # PyTorch BatchNorm default eps


def convtransr_kernel(e1_ref, e2_ref, wband_ref, bconv_ref, wfc_ref, bfc_ref,
                      emb_rel_t_ref, out_ref):
    # tanh of the two gathered entity embeddings (bn0/bn1 are folded into the
    # band conv weight + position-dependent bias built in the wrapper).
    x = jnp.concatenate(
        [jnp.tanh(e1_ref[...].astype(jnp.float32)),
         jnp.tanh(e2_ref[...].astype(jnp.float32))], axis=1)          # (TB, 2*D)

    # Conv1d(2->C, k=3, pad=1) + bn0 + bn1 as ONE structured MXU matmul.  The band
    # weight's columns are already in the PyTorch fc-flatten order (c*D + d), so no
    # per-channel tiling / RMW passes and no relayout before the fc matmul.
    conv = jnp.dot(x.astype(jnp.bfloat16), wband_ref[...],
                   preferred_element_type=jnp.float32)                # (TB, CD_pad)
    h = jnp.maximum(conv + bconv_ref[...], 0.0)                       # relu

    # fc + bn2 (folded): one (TB, CD_pad) x (CD_pad, E_pad) matmul, bf16 in / f32 acc.
    z = jnp.dot(h.astype(jnp.bfloat16), wfc_ref[...],
                preferred_element_type=jnp.float32) + bfc_ref[...]
    z = jnp.maximum(z, 0.0)

    # relation scores: canonical (TB, E_pad) x (E_pad, R_pad) matmul; emb_rel is
    # pre-transposed in the wrapper so the resident block is lane-dense and no
    # per-step XLU transpose is needed.
    out_ref[...] = jnp.dot(z.astype(jnp.bfloat16), emb_rel_t_ref[...],
                           preferred_element_type=jnp.float32)        # (TB, R_pad)


def conv_trans_r_forward(embedding, emb_rel, triplets, params, *, batch_tile=256):
    """ConvTransR.forward (eval-mode BN) with the compute in a Pallas TPU kernel.

    batch_tile: rows per grid step.  256 fills the 256-wide MXU on v6e/v7x (use 128
    on v5e); the tile is shrunk automatically if it does not fit the generation's
    VMEM budget.
    """
    (w_conv, b_conv,
     bn0_g, bn0_b, bn0_m, bn0_v,
     bn1_g, bn1_b, bn1_m, bn1_v,
     w_fc, b_fc,
     bn2_g, bn2_b, bn2_m, bn2_v) = params

    B = triplets.shape[0]
    C, in_ch, K = w_conv.shape
    D = embedding.shape[1]
    E = w_fc.shape[0]
    CD = w_fc.shape[1]
    R = emb_rel.shape[0]
    assert in_ch == 2 and K == 3, "ConvTransR uses Conv1d(2 -> C, kernel_size=3)"
    assert CD == C * D

    def _rup(a, m):
        return ((a + m - 1) // m) * m

    CD_pad = _rup(CD, 128)
    E_pad = _rup(E, 128)
    R_pad = _rup(R, 128)
    act_bytes = jnp.dtype(embedding.dtype).itemsize

    # ---- fold BatchNorm (eval form) into scale / shift ------------------------
    def fold(g, b, m, v):
        s = g / jnp.sqrt(v + EPS)
        return s, b - m * s

    bn0_s, bn0_sh = fold(bn0_g, bn0_b, bn0_m, bn0_v)     # per input channel (2,)
    bn1_s, bn1_sh = fold(bn1_g, bn1_b, bn1_m, bn1_v)     # per conv channel (C,)
    bn2_s, bn2_sh = fold(bn2_g, bn2_b, bn2_m, bn2_v)     # per fc output    (E,)

    # ---- conv as a band matrix: row = (i*D + d'), col = (c*D + d) --------------
    # wband[i*D+d', c*D+d] = w_conv[c,i,k] * bn0_s[i] * bn1_s[c], with k = d'-d+1.
    w_fold = w_conv * bn0_s[None, :, None] * bn1_s[:, None, None]     # (C, 2, 3)
    wf = jnp.transpose(w_fold, (1, 0, 2))                             # (2, C, 3)
    koff = jnp.arange(D)[:, None] - jnp.arange(D)[None, :] + 1        # (D', D)
    valid = ((koff >= 0) & (koff <= 2)).astype(w_conv.dtype)
    band = wf[:, :, jnp.clip(koff, 0, 2)] * valid[None, None]         # (2, C, D', D)
    band = jnp.transpose(band, (0, 2, 1, 3)).reshape(2 * D, CD)       # (2D, C*D)
    wband_k = (jnp.zeros((2 * D, CD_pad), jnp.float32)
               .at[:, :CD].set(band).astype(jnp.bfloat16))

    # position-dependent conv bias: bn0 shift folded through the conv taps, with
    # corrected values at the zero-padded boundary columns (d=0 and d=D-1 only see
    # two taps), then conv bias + bn1 folded on top.  Column layout = (c*D + d).
    w_t = w_conv * bn0_sh[None, :, None]                              # (C, 2, 3)
    add_full = w_t.sum(axis=(1, 2))
    add_d0 = w_t[:, :, 1:].sum(axis=(1, 2))                           # k=0 tap missing
    add_dl = w_t[:, :, :2].sum(axis=(1, 2))                           # k=2 tap missing
    bias_cd = jnp.broadcast_to(add_full[:, None], (C, D))
    bias_cd = bias_cd.at[:, 0].set(add_d0).at[:, D - 1].set(add_dl)
    bias_cd = bn1_s[:, None] * (b_conv[:, None] + bias_cd) + bn1_sh[:, None]
    bconv_k = (jnp.zeros((1, CD_pad), jnp.float32)
               .at[0, :CD].set(bias_cd.reshape(-1)))

    # fc with bn2 scale folded into the output columns; zero-pad (exact) to
    # lane-dense CD_pad x E_pad; bf16 for the MXU.
    wfc_k = (jnp.zeros((CD_pad, E_pad), jnp.float32)
             .at[:CD, :E].set(w_fc.T * bn2_s[None, :]).astype(jnp.bfloat16))
    bfc_k = (jnp.zeros((1, E_pad), jnp.float32)
             .at[0, :E].set(b_fc * bn2_s + bn2_sh))

    # relation table pre-transposed (E_pad, R_pad): canonical MXU feed, lane-dense.
    emb_rel_t_k = (jnp.zeros((E_pad, R_pad), jnp.float32)
                   .at[:E, :R].set(emb_rel.T).astype(jnp.bfloat16))

    # ---- batch tile / VMEM budget (generation aware) ---------------------------
    def vmem_needed(tb_):
        resident = (2 * D * CD_pad * 2 + CD_pad * 4 + CD_pad * E_pad * 2
                    + E_pad * 4 + E_pad * R_pad * 2)
        streamed = 2 * (2 * tb_ * D * act_bytes) + 2 * tb_ * R_pad * 4
        temps = tb_ * (2 * D * 6 + CD_pad * 6 + E_pad * 6 + R_pad * 4)
        return 2 * resident + streamed + temps   # worst case: weights double-buffered

    try:  # 128 MiB on v5e/v6e, 64 MiB on v7x
        vmem_cap = int(pltpu.get_tpu_info().vmem_capacity_bytes)
    except Exception:
        vmem_cap = 64 * 2 ** 20                  # assume the smallest (v7x)
    vmem_budget = vmem_cap * 3 // 4              # headroom for compiler buffers

    tb = _rup(max(8, min(int(batch_tile), _rup(B, 8))), 8)
    if _rup(B, tb) // tb < 2 and B > 8:          # >=2 parallel steps (v7x: 2 TCs)
        tb = _rup((B + 1) // 2, 8)
    while tb > 8 and vmem_needed(tb) > vmem_budget:
        tb = max(8, _rup(tb // 2, 8))
    B_pad = _rup(B, tb)
    vmem_limit = int(min(vmem_budget, max(2 * vmem_needed(tb), 32 * 2 ** 20)))

    # glue: gather head/tail entity rows in the embedding's NATIVE dtype (upcast +
    # tanh happen in-kernel), pad the batch to a whole number of tiles.
    e1 = embedding[triplets[:, 0]]
    e2 = embedding[triplets[:, 2]]
    if B_pad != B:
        pad = jnp.zeros((B_pad - B, D), embedding.dtype)
        e1 = jnp.concatenate([e1, pad], axis=0)
        e2 = jnp.concatenate([e2, pad], axis=0)

    def make_call(single_buffer_weights):
        def resident(shape):
            if single_buffer_weights:
                return pl.BlockSpec(shape, lambda i: (0, 0),
                                    pipeline_mode=pl.Buffered(1))
            return pl.BlockSpec(shape, lambda i: (0, 0))

        return pl.pallas_call(
            convtransr_kernel,
            out_shape=jax.ShapeDtypeStruct((B_pad, R_pad), jnp.float32),
            grid=(B_pad // tb,),
            in_specs=[
                pl.BlockSpec((tb, D), lambda i: (i, 0)),      # e1 (batch-tiled)
                pl.BlockSpec((tb, D), lambda i: (i, 0)),      # e2 (batch-tiled)
                resident((2 * D, CD_pad)),                    # conv band weight
                resident((1, CD_pad)),                        # conv bias (pos-dep)
                resident((CD_pad, E_pad)),                    # fc weight
                resident((1, E_pad)),                         # fc bias
                resident((E_pad, R_pad)),                     # emb_rel^T
            ],
            out_specs=pl.BlockSpec((tb, R_pad), lambda i: (i, 0)),
            compiler_params=pltpu.CompilerParams(
                dimension_semantics=("parallel",),
                vmem_limit_bytes=vmem_limit),
        )

    args = (e1, e2, wband_k, bconv_k, wfc_k, bfc_k, emb_rel_t_k)
    try:
        # resident weights single-buffered (saves VMEM, most valuable on v7x's 64 MiB)
        out = jax.block_until_ready(make_call(True)(*args))
    except Exception:
        # pipeline_mode=pl.Buffered(1) unsupported on this jax version -> fall back
        # to default double-buffered resident blocks (still correct).
        out = make_call(False)(*args)

    return out[:B, :R]


def reference_forward(embedding, emb_rel, triplets, params):
    """Pure-JAX reference mirroring the PyTorch forward (BN in eval mode, f32)."""
    (w_conv, b_conv,
     bn0_g, bn0_b, bn0_m, bn0_v,
     bn1_g, bn1_b, bn1_m, bn1_v,
     w_fc, b_fc,
     bn2_g, bn2_b, bn2_m, bn2_v) = params
    e_all = jnp.tanh(embedding)
    e1 = e_all[triplets[:, 0]][:, None, :]
    e2 = e_all[triplets[:, 2]][:, None, :]
    x = jnp.concatenate([e1, e2], axis=1)                        # (B, 2, D)
    x = ((x - bn0_m[None, :, None]) / jnp.sqrt(bn0_v[None, :, None] + EPS)
         * bn0_g[None, :, None] + bn0_b[None, :, None])
    x = lax.conv_general_dilated(x, w_conv, window_strides=(1,),
                                 padding=[(1, 1)],
                                 dimension_numbers=('NCH', 'OIH', 'NCH'))
    x = x + b_conv[None, :, None]
    x = ((x - bn1_m[None, :, None]) / jnp.sqrt(bn1_v[None, :, None] + EPS)
         * bn1_g[None, :, None] + bn1_b[None, :, None])
    x = jnp.maximum(x, 0.0)
    B = triplets.shape[0]
    x = x.reshape(B, -1)
    x = x @ w_fc.T + b_fc
    x = (x - bn2_m) / jnp.sqrt(bn2_v + EPS) * bn2_g + bn2_b
    x = jnp.maximum(x, 0.0)
    return x @ emb_rel.T


if __name__ == "__main__":
    num_entities = 32
    embedding_dim = 32
    num_relations = 8
    channels = 8
    kernel_size = 3
    batch = 24

    key = jax.random.PRNGKey(0)
    ks = jax.random.split(key, 10)

    embedding = jax.random.normal(ks[0], (num_entities, embedding_dim), jnp.float32)
    emb_rel = jax.random.normal(ks[1], (num_relations, embedding_dim), jnp.float32)
    triplets = jax.random.randint(ks[2], (batch, 3), 0, num_entities, jnp.int32)

    w_conv = 0.1 * jax.random.normal(ks[3], (channels, 2, kernel_size), jnp.float32)
    b_conv = 0.1 * jax.random.normal(ks[4], (channels,), jnp.float32)

    def bn_params(k, n):
        k1, k2, k3, k4 = jax.random.split(k, 4)
        g = 1.0 + 0.1 * jax.random.normal(k1, (n,), jnp.float32)
        b = 0.1 * jax.random.normal(k2, (n,), jnp.float32)
        m = 0.1 * jax.random.normal(k3, (n,), jnp.float32)
        v = jax.random.uniform(k4, (n,), jnp.float32, 0.5, 1.5)
        return g, b, m, v

    bn0_g, bn0_b, bn0_m, bn0_v = bn_params(ks[5], 2)
    bn1_g, bn1_b, bn1_m, bn1_v = bn_params(ks[6], channels)
    bn2_g, bn2_b, bn2_m, bn2_v = bn_params(ks[7], embedding_dim)

    w_fc = 0.05 * jax.random.normal(ks[8], (embedding_dim, embedding_dim * channels),
                                    jnp.float32)
    b_fc = 0.1 * jax.random.normal(ks[9], (embedding_dim,), jnp.float32)

    params = (w_conv, b_conv,
              bn0_g, bn0_b, bn0_m, bn0_v,
              bn1_g, bn1_b, bn1_m, bn1_v,
              w_fc, b_fc,
              bn2_g, bn2_b, bn2_m, bn2_v)

    out = conv_trans_r_forward(embedding, emb_rel, triplets, params, batch_tile=8)
    out = jax.block_until_ready(out)

    ref = jax.block_until_ready(reference_forward(embedding, emb_rel, triplets, params))
    max_err = float(jnp.max(jnp.abs(out - ref)))
    assert out.shape == (batch, num_relations), out.shape
    # bf16 MXU inputs with f32 accumulation -> slightly looser tolerance than pure f32
    assert max_err < 5e-2, f"mismatch vs reference: max abs err {max_err}"

    print("KERNEL_OK")
</pallas_src>

<mosaic_0001>
module attributes {stable_mosaic.version = 11 : i64} {
  func.func @convtransr_kernel(%arg0: i32, %arg1: memref<8x32xf32, #tpu.memory_space<vmem>>, %arg2: memref<8x32xf32, #tpu.memory_space<vmem>>, %arg3: memref<64x256xbf16, #tpu.memory_space<vmem>>, %arg4: memref<1x256xf32, #tpu.memory_space<vmem>>, %arg5: memref<256x128xbf16, #tpu.memory_space<vmem>>, %arg6: memref<1x128xf32, #tpu.memory_space<vmem>>, %arg7: memref<128x128xbf16, #tpu.memory_space<vmem>>, %arg8: memref<8x128xf32, #tpu.memory_space<vmem>>) attributes {dimension_semantics = [#tpu.dimension_semantics<parallel>], iteration_bounds = array<i64: 3>, scalar_prefetch = 0 : i64, scratch_operands = 0 : i64, tpu.core_type = #tpu.core_type<tc>, window_params = [{transform_indices = @transform_0, window_bounds = array<i64: 8, 32>}, {transform_indices = @transform_1, window_bounds = array<i64: 8, 32>}, {pipeline_mode = #tpu.pipeline_mode<synchronous>, transform_indices = @transform_2, window_bounds = array<i64: 64, 256>}, {pipeline_mode = #tpu.pipeline_mode<synchronous>, transform_indices = @transform_3, window_bounds = array<i64: 1, 256>}, {pipeline_mode = #tpu.pipeline_mode<synchronous>, transform_indices = @transform_4, window_bounds = array<i64: 256, 128>}, {pipeline_mode = #tpu.pipeline_mode<synchronous>, transform_indices = @transform_5, window_bounds = array<i64: 1, 128>}, {pipeline_mode = #tpu.pipeline_mode<synchronous>, transform_indices = @transform_6, window_bounds = array<i64: 128, 128>}, {transform_indices = @transform_7, window_bounds = array<i64: 8, 128>}]} {
    %c0 = arith.constant 0 : index
    %c0_0 = arith.constant 0 : index
    %0 = vector.load %arg1[%c0, %c0_0] : memref<8x32xf32, #tpu.memory_space<vmem>>, vector<8x32xf32>
    %1 = math.tanh %0 : vector<8x32xf32>
    %c0_1 = arith.constant 0 : index
    %c0_2 = arith.constant 0 : index
    %2 = vector.load %arg2[%c0_1, %c0_2] : memref<8x32xf32, #tpu.memory_space<vmem>>, vector<8x32xf32>
    %3 = math.tanh %2 : vector<8x32xf32>
    %4 = tpu.concatenate %1, %3 in 1 : vector<8x32xf32>, vector<8x32xf32> -> vector<8x64xf32>
    %5 = arith.truncf %4 : vector<8x64xf32> to vector<8x64xbf16>
    %c0_3 = arith.constant 0 : index
    %c0_4 = arith.constant 0 : index
    %6 = vector.load %arg3[%c0_3, %c0_4] : memref<64x256xbf16, #tpu.memory_space<vmem>>, vector<64x256xbf16>
    %cst = arith.constant dense<0.000000e+00> : vector<8x256xf32>
    %7 = tpu.matmul %5, %6, %cst {dimension_numbers = #tpu.dot_dimension_numbers<[1], [0], [0], [1], [0, 0, 1, 1], [], []>} : vector<8x64xbf16>, vector<64x256xbf16>, vector<8x256xf32> -> vector<8x256xf32>
    %c0_5 = arith.constant 0 : index
    %c0_6 = arith.constant 0 : index
    %8 = vector.load %arg4[%c0_5, %c0_6] : memref<1x256xf32, #tpu.memory_space<vmem>>, vector<1x256xf32>
    %9 = vector.broadcast %8 : vector<1x256xf32> to vector<8x256xf32>
    %10 = arith.addf %7, %9 : vector<8x256xf32>
    %cst_7 = arith.constant 0.000000e+00 : f32
    %11 = vector.broadcast %cst_7 : f32 to vector<8x256xf32>
    %12 = arith.maximumf %10, %11 : vector<8x256xf32>
    %13 = arith.truncf %12 : vector<8x256xf32> to vector<8x256xbf16>
    %c0_8 = arith.constant 0 : index
    %c0_9 = arith.constant 0 : index
    %14 = vector.load %arg5[%c0_8, %c0_9] : memref<256x128xbf16, #tpu.memory_space<vmem>>, vector<256x128xbf16>
    %cst_10 = arith.constant dense<0.000000e+00> : vector<8x128xf32>
    %15 = tpu.matmul %13, %14, %cst_10 {dimension_numbers = #tpu.dot_dimension_numbers<[1], [0], [0], [1], [0, 0, 1, 1], [], []>} : vector<8x256xbf16>, vector<256x128xbf16>, vector<8x128xf32> -> vector<8x128xf32>
    %c0_11 = arith.constant 0 : index
    %c0_12 = arith.constant 0 : index
    %16 = vector.load %arg6[%c0_11, %c0_12] : memref<1x128xf32, #tpu.memory_space<vmem>>, vector<1x128xf32>
    %17 = vector.broadcast %16 : vector<1x128xf32> to vector<8x128xf32>
    %18 = arith.addf %15, %17 : vector<8x128xf32>
    %cst_13 = arith.constant 0.000000e+00 : f32
    %19 = vector.broadcast %cst_13 : f32 to vector<8x128xf32>
    %20 = arith.maximumf %18, %19 : vector<8x128xf32>
    %21 = arith.truncf %20 : vector<8x128xf32> to vector<8x128xbf16>
    %c0_14 = arith.constant 0 : index
    %c0_15 = arith.constant 0 : index
    %22 = vector.load %arg7[%c0_14, %c0_15] : memref<128x128xbf16, #tpu.memory_space<vmem>>, vector<128x128xbf16>
    %cst_16 = arith.constant dense<0.000000e+00> : vector<8x128xf32>
    %23 = tpu.matmul %21, %22, %cst_16 {dimension_numbers = #tpu.dot_dimension_numbers<[1], [0], [0], [1], [0, 0, 1, 1], [], []>} : vector<8x128xbf16>, vector<128x128xbf16>, vector<8x128xf32> -> vector<8x128xf32>
    %c0_17 = arith.constant 0 : index
    %c0_18 = arith.constant 0 : index
    %24 = vector.load %arg8[%c0_17, %c0_18] : memref<8x128xf32, #tpu.memory_space<vmem>>, vector<8x128xf32>
    tpu.vector_store %arg8[%c0_17, %c0_18], %23 {strides = array<i32>} : memref<8x128xf32, #tpu.memory_space<vmem>>, vector<8x128xf32>,
    return
  }
  func.func @transform_0(%arg0: i32) -> (i32, i32) {
    %c0_i32 = arith.constant 0 : i32
    %c0_i32_0 = arith.constant 0 : i32
    return %arg0, %c0_i32 : i32, i32
  }
  func.func @transform_1(%arg0: i32) -> (i32, i32) {
    %c0_i32 = arith.constant 0 : i32
    %c0_i32_0 = arith.constant 0 : i32
    return %arg0, %c0_i32 : i32, i32
  }
  func.func @transform_2(%arg0: i32) -> (i32, i32) {
    %c0_i32 = arith.constant 0 : i32
    %c0_i32_0 = arith.constant 0 : i32
    %c0_i32_1 = arith.constant 0 : i32
    return %c0_i32, %c0_i32_0 : i32, i32
  }
  func.func @transform_3(%arg0: i32) -> (i32, i32) {
    %c0_i32 = arith.constant 0 : i32
    %c0_i32_0 = arith.constant 0 : i32
    %c0_i32_1 = arith.constant 0 : i32
    return %c0_i32, %c0_i32_0 : i32, i32
  }
  func.func @transform_4(%arg0: i32) -> (i32, i32) {
    %c0_i32 = arith.constant 0 : i32
    %c0_i32_0 = arith.constant 0 : i32
    %c0_i32_1 = arith.constant 0 : i32
    return %c0_i32, %c0_i32_0 : i32, i32
  }
  func.func @transform_5(%arg0: i32) -> (i32, i32) {
    %c0_i32 = arith.constant 0 : i32
    %c0_i32_0 = arith.constant 0 : i32
    %c0_i32_1 = arith.constant 0 : i32
    return %c0_i32, %c0_i32_0 : i32, i32
  }
  func.func @transform_6(%arg0: i32) -> (i32, i32) {
    %c0_i32 = arith.constant 0 : i32
    %c0_i32_0 = arith.constant 0 : i32
    %c0_i32_1 = arith.constant 0 : i32
    return %c0_i32, %c0_i32_0 : i32, i32
  }
  func.func @transform_7(%arg0: i32) -> (i32, i32) {
    %c0_i32 = arith.constant 0 : i32
    %c0_i32_0 = arith.constant 0 : i32
    return %arg0, %c0_i32 : i32, i32
  }
}

module attributes {stable_mosaic.version = 11 : i64} {
  func.func @convtransr_kernel(%arg0: i32, %arg1: memref<8x32xf32, #tpu.memory_space<vmem>>, %arg2: memref<8x32xf32, #tpu.memory_space<vmem>>, %arg3: memref<64x256xbf16, #tpu.memory_space<vmem>>, %arg4: memref<1x256xf32, #tpu.memory_space<vmem>>, %arg5: memref<256x128xbf16, #tpu.memory_space<vmem>>, %arg6: memref<1x128xf32, #tpu.memory_space<vmem>>, %arg7: memref<128x128xbf16, #tpu.memory_space<vmem>>, %arg8: memref<8x128xf32, #tpu.memory_space<vmem>>) attributes {dimension_semantics = [#tpu.dimension_semantics<parallel>], iteration_bounds = array<i64: 3>, scalar_prefetch = 0 : i64, scratch_operands = 0 : i64, tpu.core_type = #tpu.core_type<tc>, window_params = [{transform_indices = @transform_0, window_bounds = array<i64: 8, 32>}, {transform_indices = @transform_1, window_bounds = array<i64: 8, 32>}, {pipeline_mode = #tpu.pipeline_mode<synchronous>, transform_indices = @transform_2, window_bounds = array<i64: 64, 256>}, {pipeline_mode = #tpu.pipeline_mode<synchronous>, transform_indices = @transform_3, window_bounds = array<i64: 1, 256>}, {pipeline_mode = #tpu.pipeline_mode<synchronous>, transform_indices = @transform_4, window_bounds = array<i64: 256, 128>}, {pipeline_mode = #tpu.pipeline_mode<synchronous>, transform_indices = @transform_5, window_bounds = array<i64: 1, 128>}, {pipeline_mode = #tpu.pipeline_mode<synchronous>, transform_indices = @transform_6, window_bounds = array<i64: 128, 128>}, {transform_indices = @transform_7, window_bounds = array<i64: 8, 128>}]} {
    %c0 = arith.constant 0 : index
    %c0_0 = arith.constant 0 : index
    %0 = vector.load %arg1[%c0, %c0_0] : memref<8x32xf32, #tpu.memory_space<vmem>>, vector<8x32xf32>
    %1 = math.tanh %0 : vector<8x32xf32>
    %c0_1 = arith.constant 0 : index
    %c0_2 = arith.constant 0 : index
    %2 = vector.load %arg2[%c0_1, %c0_2] : memref<8x32xf32, #tpu.memory_space<vmem>>, vector<8x32xf32>
    %3 = math.tanh %2 : vector<8x32xf32>
    %4 = tpu.concatenate %1, %3 in 1 : vector<8x32xf32>, vector<8x32xf32> -> vector<8x64xf32>
    %5 = arith.truncf %4 : vector<8x64xf32> to vector<8x64xbf16>
    %c0_3 = arith.constant 0 : index
    %c0_4 = arith.constant 0 : index
    %6 = vector.load %arg3[%c0_3, %c0_4] : memref<64x256xbf16, #tpu.memory_space<vmem>>, vector<64x256xbf16>
    %cst = arith.constant dense<0.000000e+00> : vector<8x256xf32>
    %7 = tpu.matmul %5, %6, %cst {dimension_numbers = #tpu.dot_dimension_numbers<[1], [0], [0], [1], [0, 0, 1, 1], [], []>} : vector<8x64xbf16>, vector<64x256xbf16>, vector<8x256xf32> -> vector<8x256xf32>
    %c0_5 = arith.constant 0 : index
    %c0_6 = arith.constant 0 : index
    %8 = vector.load %arg4[%c0_5, %c0_6] : memref<1x256xf32, #tpu.memory_space<vmem>>, vector<1x256xf32>
    %9 = vector.broadcast %8 : vector<1x256xf32> to vector<8x256xf32>
    %10 = arith.addf %7, %9 : vector<8x256xf32>
    %cst_7 = arith.constant 0.000000e+00 : f32
    %11 = vector.broadcast %cst_7 : f32 to vector<8x256xf32>
    %12 = arith.maximumf %10, %11 : vector<8x256xf32>
    %13 = arith.truncf %12 : vector<8x256xf32> to vector<8x256xbf16>
    %c0_8 = arith.constant 0 : index
    %c0_9 = arith.constant 0 : index
    %14 = vector.load %arg5[%c0_8, %c0_9] : memref<256x128xbf16, #tpu.memory_space<vmem>>, vector<256x128xbf16>
    %cst_10 = arith.constant dense<0.000000e+00> : vector<8x128xf32>
    %15 = tpu.matmul %13, %14, %cst_10 {dimension_numbers = #tpu.dot_dimension_numbers<[1], [0], [0], [1], [0, 0, 1, 1], [], []>} : vector<8x256xbf16>, vector<256x128xbf16>, vector<8x128xf32> -> vector<8x128xf32>
    %c0_11 = arith.constant 0 : index
    %c0_12 = arith.constant 0 : index
    %16 = vector.load %arg6[%c0_11, %c0_12] : memref<1x128xf32, #tpu.memory_space<vmem>>, vector<1x128xf32>
    %17 = vector.broadcast %16 : vector<1x128xf32> to vector<8x128xf32>
    %18 = arith.addf %15, %17 : vector<8x128xf32>
    %cst_13 = arith.constant 0.000000e+00 : f32
    %19 = vector.broadcast %cst_13 : f32 to vector<8x128xf32>
    %20 = arith.maximumf %18, %19 : vector<8x128xf32>
    %21 = arith.truncf %20 : vector<8x128xf32> to vector<8x128xbf16>
    %c0_14 = arith.constant 0 : index
    %c0_15 = arith.constant 0 : index
    %22 = vector.load %arg7[%c0_14, %c0_15] : memref<128x128xbf16, #tpu.memory_space<vmem>>, vector<128x128xbf16>
    %cst_16 = arith.constant dense<0.000000e+00> : vector<8x128xf32>
    %23 = tpu.matmul %21, %22, %cst_16 {dimension_numbers = #tpu.dot_dimension_numbers<[1], [0], [0], [1], [0, 0, 1, 1], [], []>} : vector<8x128xbf16>, vector<128x128xbf16>, vector<8x128xf32> -> vector<8x128xf32>
    %c0_17 = arith.constant 0 : index
    %c0_18 = arith.constant 0 : index
    %24 = vector.load %arg8[%c0_17, %c0_18] : memref<8x128xf32, #tpu.memory_space<vmem>>, vector<8x128xf32>
    tpu.vector_store %arg8[%c0_17, %c0_18], %23 {strides = array<i32>} : memref<8x128xf32, #tpu.memory_space<vmem>>, vector<8x128xf32>,
    return
  }
  func.func @transform_0(%arg0: i32) -> (i32, i32) {
    %c0_i32 = arith.constant 0 : i32
    %c0_i32_0 = arith.constant 0 : i32
    return %arg0, %c0_i32 : i32, i32
  }
  func.func @transform_1(%arg0: i32) -> (i32, i32) {
    %c0_i32 = arith.constant 0 : i32
    %c0_i32_0 = arith.constant 0 : i32
    return %arg0, %c0_i32 : i32, i32
  }
  func.func @transform_2(%arg0: i32) -> (i32, i32) {
    %c0_i32 = arith.constant 0 : i32
    %c0_i32_0 = arith.constant 0 : i32
    %c0_i32_1 = arith.constant 0 : i32
    return %c0_i32, %c0_i32_0 : i32, i32
  }
  func.func @transform_3(%arg0: i32) -> (i32, i32) {
    %c0_i32 = arith.constant 0 : i32
    %c0_i32_0 = arith.constant 0 : i32
    %c0_i32_1 = arith.constant 0 : i32
    return %c0_i32, %c0_i32_0 : i32, i32
  }
  func.func @transform_4(%arg0: i32) -> (i32, i32) {
    %c0_i32 = arith.constant 0 : i32
    %c0_i32_0 = arith.constant 0 : i32
    %c0_i32_1 = arith.constant 0 : i32
    return %c0_i32, %c0_i32_0 : i32, i32
  }
  func.func @transform_5(%arg0: i32) -> (i32, i32) {
    %c0_i32 = arith.constant 0 : i32
    %c0_i32_0 = arith.constant 0 : i32
    %c0_i32_1 = arith.constant 0 : i32
    return %c0_i32, %c0_i32_0 : i32, i32
  }
  func.func @transform_6(%arg0: i32) -> (i32, i32) {
    %c0_i32 = arith.constant 0 : i32
    %c0_i32_0 = arith.constant 0 : i32
    %c0_i32_1 = arith.constant 0 : i32
    return %c0_i32, %c0_i32_0 : i32, i32
  }
  func.func @transform_7(%arg0: i32) -> (i32, i32) {
    %c0_i32 = arith.constant 0 : i32
    %c0_i32_0 = arith.constant 0 : i32
    return %arg0, %c0_i32 : i32, i32
  }
}

</mosaic_0001>

<bundles_post_ra>
// kernel: tpu_custom_call.1
= control target key start
LH: loop header
LB: loop body
LE: loop exit
PB: predicated region body
PF: predicated region fallthrough
CT: control target
= control target key end

     0   :  { %s1608_s0 = inlined_call_operand.hbm [shape: f32[24,32], index: 0, kind: input, shape index: {}]   ;;  %s1609_s1 = inlined_call_operand.hbm [shape: f32[24,32], index: 1, kind: input, shape index: {}]   ;;  %s1610_s2 = inlined_call_operand.hbm [shape: bf16[64,256], index: 2, kind: input, shape index: {}]   ;;  %s1611_s3 = inlined_call_operand.vmem [shape: f32[1,256], index: 3, kind: input, shape index: {}]   ;;  %s1612_s4 = inlined_call_operand.hbm [shape: bf16[256,128], index: 4, kind: input, shape index: {}]   ;;  %s1613_s5 = inlined_call_operand.vmem [shape: f32[1,128], index: 5, kind: input, shape index: {}]   ;;  %s1614_s6 = inlined_call_operand.hbm [shape: bf16[128,128], index: 6, kind: input, shape index: {}]   ;;  %s1615_s7 = inlined_call_operand.hbm [shape: f32[24,128], index: 7, kind: output, shape index: {}]  }
   0x1   :  { %1619 = sst [smem:[#allocation20_spill]] %s1610_s2 }
   0x2   :  { %1620 = sst [smem:[#allocation21_spill]] %s1612_s4 }
   0x3   :  { %1621 = sst [smem:[#allocation22_spill]] %s1614_s6 }
   0x4   :  { %12 = vsyncpa [#allocation3], 0 }
   0x5   :  { %14 = vsyncpa [#allocation3 + $0x1], 0 }
   0x6   :  { %15 = vsyncpa [#allocation6], 0 }
   0x7   :  { %17 = vsyncpa [#allocation6 + $0x1], 0 }
   0x8   :  { %18 = vsyncpa [#allocation9], 0 }
   0x9   :  { %19 = vsyncpa [#allocation4], 0 }
   0xa   :  { %21 = vsyncpa [#allocation4 + $0x1], 0  ;;  %s1412_s24 = smov 0   ;;  %s1414_s25 = smov 0  }
   0xb   :  { %s1416_s26 = smov 0   ;;  %s1418_s27 = smov 0  }
   0xc LB: > { %1622 = sst [smem:[#allocation17_spill]] %s1358_s26  ;;  %s1436_s8 = sadd.s32 4294967295, %s1362_s27   ;;  %s1362_s27 = sphi %s1418_s27, %s1635_s27   ;;  %s1358_s26 = sphi %s1416_s26, %s1637_s26   ;;  %s1354_s25 = sphi %s1414_s25, %s1639_s25   ;;  %s1350_s24 = sphi %s1412_s24, %s1638_s24  }
   0xd   : > { %s1623_s2 = sld [smem:[#allocation20_spill]]  ;;  %p860_p0 = scmp.ge.s32.totalorder %s1362_s27, 1 }
   0xe   : > { %p48_p1 = scmp.eq.s32.totalorder %s1436_s8, 0  ;;  %p215_p2 = scmp.lt.s32.totalorder %s1362_s27, 4 }
   0xf   : > { %s1364_s10 = smov [#allocation7]   ;;  %s1625_s4 = sld [smem:[#allocation21_spill]] }
  0x10   : > { %p1441_p3 = pnand %p860_p0, %p215_p2  ;;  %s228_s11 = sshll.u32 %s1364_s10, 4  ;;  %s229_s11 = int_to_ptr.vmem [resolvable:$true] %s228_s11 }
  0x11   : > { %s1365_s16 = smov [#allocation8]   ;;  %s1366_s18 = smov 128  }
  0x12   : > { %p1060_p4 = pneg %p1441_p3  ;;  %s245_s17 = sshll.u32 %s1365_s16, 4  ;;  %s246_s17 = int_to_ptr.vmem [resolvable:$true] %s245_s17 }
  0x13   : > { %s226_s30 = sshll.u32 %s1623_s2, 4  ;;  %s1367_s19 = smov 8   ;;  %s227_s30 = int_to_ptr.hbm [resolvable:$true] %s226_s30 }
  0x14   : > { %p1452_p5 = pnand %p1060_p4, %p48_p1  ;;  %s1368_s20 = smov 64  }
  0x15   : > { %s243_s14 = sshll.u32 %s1625_s4, 4  ;;  %s1369_s21 = smov 4   ;;  %s244_s14 = int_to_ptr.hbm [resolvable:$true] %s243_s14 }
  0x16   : > { %1063 = dma.hbm_to_vmem [thread:$0]  (!%p1452_p5), %s227_s30, 1024, %s229_s11, [#allocation6], %s1366_s18, %s1366_s18, %s1367_s19  }
  0x17   : > { %1066 = dma.hbm_to_vmem [thread:$0]  (!%p1452_p5), %s244_s14, 2048, %s246_s17, [#allocation9], %s1368_s20, %s1368_s20, %s1369_s21  }
  0x18   : > { %s1627_s6 = sld [smem:[#allocation22_spill]]  ;;  %s1370_s29 = smov [#allocation10]  }
  0x19   : > { %s262_s10 = sshll.u32 %s1370_s29, 4  ;;  %s859_s30 = sadd.s32 4294967294, %s1362_s27   ;;  %s263_s10 = int_to_ptr.vmem [resolvable:$true] %s262_s10 }
  0x1a   : > { %s1467_s11 = sadd.s32 1, %s1362_s27   ;;  %s34_s12 = sadd.s32 1, %s1358_s26 }
  0x1b   : > { %1628 = sst [smem:[#allocation18_spill]] %s1467_s11  ;;  %s31_s13 = ssub.s32 %s1362_s27, %s1467_s11 }
  0x1c   : > { %p41_p6 = scmp.ne.s32.totalorder %s1358_s26, %s1354_s25  ;;  %p32_p7 = scmp.eq.s32.totalorder %s31_s13, 0 }
  0x1d   : > { %p42_p8 = scmp.eq.s32.totalorder %s1362_s27, 0  ;;  %p47_p9 = scmp.ne.s32.totalorder %s1354_s25, %s1350_s24 }
  0x1e   : > { %s260_s28 = sshll.u32 %s1627_s6, 4  ;;  %p202_p10 = scmp.eq.s32.totalorder %s1436_s8, 2  ;;  %s261_s28 = int_to_ptr.hbm [resolvable:$true] %s260_s28 }
  0x1f   : > { %1069 = dma.hbm_to_vmem [thread:$0]  (!%p1452_p5), %s261_s28, 1024, %s263_s10, [#allocation9], %s1368_s20, %s1368_s20, %s1369_s21  }
  0x20   : > { %s1479_s14 = scalar_select %p32_p7, %s1358_s26, %s34_s12  }
  0x21   : > { %p1481_p11 = por %p42_p8, %p41_p6  ;;  %p1487_p12 = por %p48_p1, %p47_p9 }
  0x22   : > { %1629 = sst [smem:[#allocation19_spill]] %s1479_s14  ;;  %p1491_p13 = por %p202_p10, %p41_p6 }
  0x23   : > { %p208_p0 = scmp.eq.s32.totalorder %s859_s30, 2  ;;  %p1084_p2 = scmp.lt.s32.totalorder %s1362_s27, 3 }
  0x24   : > { %s276_s18 = sand.u32 1, %s1358_s26   ;;  %s866_s21 = sshll.u32 %s1362_s27, 3 }
  0x25   : > { %p1497_p4 = por %p208_p0, %p47_p9  ;;  %s865_s20 = sshll.u32 %s276_s18, 3 }
  0x26   : > { %s284_s28 = scalar_lea.hbm %s1608_s0, %s866_s21  ;;  %s280_s10 = scalar_lea.vmem [#allocation2], %s865_s20 }
  0x27   : > { %s286_s29 = sshll.u32 %s284_s28, 4  ;;  %s288_s12 = sshll.u32 %s280_s10, 4  ;;  %s287_s29 = int_to_ptr.hbm [resolvable:$true] %s286_s29  ;;  %s289_s12 = int_to_ptr.vmem [resolvable:$true] %s288_s12 }
  0x28   : > { %p1507_p5 = pnand %p1084_p2, %p1481_p11  ;;  %s303_s4 = scalar_lea.hbm %s1609_s1, %s866_s21 }
  0x29   : > { %s295_s6 = sand.u32 1, %s1362_s27   ;;  %s277_s14 = scalar_lea.sflag [#allocation3], %s276_s18 }
  0x2a   : > { %s1224_s22 = sshra.s32 %s287_s29, 4  ;;  %p1228_p7 = pneg %p1507_p5  ;;  %s1225_s22 = int_to_ptr.hbm [resolvable:$true] %s1224_s22 }
  0x2b   : > { %s1226_s23 = scalar_lea.hbm %s1225_s22, 8  ;;  %s1231_s10 = scalar_lea.hbm %s1608_s0, 24 }
  0x2c   : > { %p1227_p6 = scmp.ne.s32.totalorder %s1225_s22, %s1226_s23  ;;  %p1232_p10 = scmp.lt.s32.totalorder %s1225_s22, %s1608_s0 }
  0x2d   : > { %p1233_p11 = scmp.lt.s32.totalorder %s1231_s10, %s1226_s23 }
  0x2e   : > { %p1229_p8 = pnand %p1228_p7, %p1227_p6 }
  0x2f   : > { %p1234_p0 = por %p1233_p11, %p1232_p10 }
  0x30   : > { %p1230_p9 = pneg %p1229_p8 }
  0x32   : > { %p1235_p2 = pnand %p1234_p0, %p1230_p9 }
  0x34   : > { %1238 = shalt.err (!%p1235_p2)
}
  0x35   : > { %1073 = dma.hbm_to_vmem [thread:$0]  (!%p1507_p5), %s287_s29, 128, %s289_s12, %s277_s14  }
  0x36   : > { %s305_s18 = sshll.u32 %s303_s4, 4  ;;  %s299_s21 = scalar_lea.vmem [#allocation5], %s865_s20  ;;  %s306_s18 = int_to_ptr.hbm [resolvable:$true] %s305_s18 }
  0x37   : > { %s307_s26 = sshll.u32 %s299_s21, 4  ;;  %s296_s11 = scalar_lea.sflag [#allocation6], %s295_s6  ;;  %s308_s26 = int_to_ptr.vmem [resolvable:$true] %s307_s26 }
  0x38   : > { %s1254_s16 = sshra.s32 %s306_s18, 4  ;;  %s1261_s10 = scalar_lea.hbm %s1609_s1, 24  ;;  %s1255_s16 = int_to_ptr.hbm [resolvable:$true] %s1254_s16 }
  0x39   : > { %s1256_s28 = scalar_lea.hbm %s1255_s16, 8  ;;  %p1262_p9 = scmp.lt.s32.totalorder %s1255_s16, %s1609_s1 }
  0x3a   : > { %p1257_p6 = scmp.ne.s32.totalorder %s1255_s16, %s1256_s28  ;;  %p1263_p11 = scmp.lt.s32.totalorder %s1261_s10, %s1256_s28 }
  0x3c   : > { %p1259_p8 = pnand %p1257_p6, %p1228_p7  ;;  %p1264_p0 = por %p1263_p11, %p1262_p9 }
  0x3e   : > { %p1260_p10 = pneg %p1259_p8 }
  0x40   : > { %p1265_p2 = pnand %p1264_p0, %p1260_p10 }
  0x42   : > { %1268 = shalt.err (!%p1265_p2)
}
  0x43   : > { %1076 = dma.hbm_to_vmem [thread:$0]  (!%p1507_p5), %s306_s18, 128, %s308_s26, %s296_s11  }
  0x44   : > { %316 = sbr.rel (%p1441_p3) target bundleno = 627 (0x273), region = 48  ;;  %s1542_s4 = sand.u32 (!%p1441_p3), 1, %s1354_s25  }
  0x45   : > { %s1545_s6 = sshll.u32 (!%p1441_p3), %s1542_s4, 3  ;;  %s319_s20 = scalar_lea.sflag (!%p1441_p3), [#allocation3], %s1542_s4 }
  0x46   : > { %s322_s29 = scalar_lea.vmem (!%p1441_p3), [#allocation2], %s1545_s6 }
  0x49   : > { %1329 = dma.done.wait (%p1487_p12), %s319_s20, 128  }
  0x4a   : > { %1331 = vsyncadd (%p1487_p12), %s319_s20, 4294967168  ;;  %s328_s26 = sand.u32 1, %s1436_s8   ;;  %s332_s11 = scalar_lea.vmem [#allocation5], %s1545_s6 }
  0x4b   : > { %s329_s9 = scalar_lea.sflag [#allocation6], %s328_s26 }
  0x4c   : > { %1333 = dma.done.wait (%p1487_p12), %s329_s9, 128  }
  0x4d   : > { %1335 = vsyncadd (%p1487_p12), %s329_s9, 4294967168 }
  0x4e   : > { %1337 = dma.done.wait (%p48_p1), [#allocation6], 1024  }
  0x4f   : > { %1339 = vsyncadd (%p48_p1), [#allocation6], 4294966272 }
  0x50   : > { %1341 = dma.done.wait (%p48_p1), [#allocation9], 3072  }
  0x51   : > { %1343 = vsyncadd (%p48_p1), [#allocation9], 4294964224  ;;  %v387_v0 = vld [vmem:[%s332_s11] sm:$0xff]  ;;  %v894_v4 = vld [vmem:[#allocation7 + $0x20] sm:$0xf]  ;;  %s1371_s15 = smov 32  }
  0x52   : > { %v902_v1 = vld [vmem:[#allocation7 + $0x30] sm:$0xf]  ;;  %v1017_v2 = vld [vmem:[#allocation7 + $0x34] sm:$0xf0]  ;;  %1130 = vtanh.f32 %v387_v0  ;;  %v1015_v5 = vld [vmem:[#allocation7 + $0x24] sm:$0xf0] }
  0x53   : > { %v903_v3 = vor.u32 %v1017_v2, %v902_v1  ;;  %v895_v6 = vor.u32 %v1015_v5, %v894_v4  ;;  %v886_v7 = vld [vmem:[#allocation7 + $0x10] sm:$0xf]  ;;  %v1013_v8 = vld [vmem:[#allocation7 + $0x14] sm:$0xf0]  ;;  %v878_v11 = vld [vmem:[#allocation7] sm:$0xf] }
  0x54   : > { %v887_v10 = vor.u32 %v1013_v8, %v886_v7  ;;  %v1011_v12 = vld [vmem:[#allocation7 + $0x4] sm:$0xf0]  ;;  %v1016_v14 = vld [vmem:[#allocation7 + $0x34] sm:$0xf]  ;;  %v904_v15 = vld [vmem:[#allocation7 + $0x38] sm:$0xf0] }
  0x55   : > { %458 = vmatpush.bf16.msra.mxu1 %v903_v3  ;;  %v879_v13 = vor.u32 %v1011_v12, %v878_v11  ;;  %v907_v16 = vor.u32 %v1016_v14, %v904_v15  ;;  %v1014_v17 = vld [vmem:[#allocation7 + $0x24] sm:$0xf]  ;;  %v896_v18 = vld [vmem:[#allocation7 + $0x28] sm:$0xf0]  ;;  %v1012_v20 = vld [vmem:[#allocation7 + $0x14] sm:$0xf] }
  0x56   : > { %v899_v19 = vor.u32 %v1014_v17, %v896_v18  ;;  %v888_v21 = vld [vmem:[#allocation7 + $0x18] sm:$0xf0]  ;;  %v1010_v23 = vld [vmem:[#allocation7 + $0x4] sm:$0xf]  ;;  %v880_v24 = vld [vmem:[#allocation7 + $0x8] sm:$0xf0] }
  0x57   : > { %v891_v22 = vor.u32 %v1012_v20, %v888_v21  ;;  %v883_v25 = vor.u32 %v1010_v23, %v880_v24  ;;  %v1025_v26 = vld [vmem:[#allocation8 + $0x38] sm:$0xff]  ;;  %v385_v27 = vld [vmem:[%s322_s29] sm:$0xff]  ;;  %v1024_v29 = vld [vmem:[#allocation8 + $0x30] sm:$0xff]  ;;  %vm393_vm0 = vcmask 261120   ;;  %vm450_vm1 = vcmask 523264   ;;  %s1007_s21 = sshll.u32 %s1436_s8, 3 }
  0x58   : > { %v1131_v9 = vpop.eup %1130  ;;  %v1033_v28 = vld [vmem:[#allocation8 + $0x78] sm:$0xff]  ;;  %616 = vmatpush.bf16.msra.mxu2 %v1025_v26  ;;  %v1032_v30 = vld [vmem:[#allocation8 + $0x70] sm:$0xff]  ;;  %1132 = vtanh.f32 %v385_v27  ;;  %v1023_v31 = vld [vmem:[#allocation8 + $0x28] sm:$0xff]  ;;  %s733_s22 = scalar_lea.hbm %s1615_s7, %s1007_s21  ;;  %s383_s23 = scalar_lea.vmem [#allocation11], %s1545_s6 }
  0x59   : > { %459 = vmatpush.bf16.msra.mxu1 %v895_v6  ;;  %390 = vrot.lane.b32.xlu0 %v1131_v9, %s1371_s15  ;;  %v1022_v33 = vld [vmem:[#allocation8 + $0x20] sm:$0xff]  ;;  %v1021_v37 = vld [vmem:[#allocation8 + $0x18] sm:$0xff]  ;;  %v1020_v38 = vld [vmem:[#allocation8 + $0x10] sm:$0xff]  ;;  %s735_s10 = sshll.u32 %s383_s23, 4  ;;  %s737_s2 = sshll.u32 %s733_s22, 4  ;;  %s736_s10 = int_to_ptr.vmem [resolvable:$true] %s735_s10  ;;  %s738_s2 = int_to_ptr.hbm [resolvable:$true] %s737_s2 }
  0x5a   : > { %629 = vmatpush.bf16.msra.mxu3 %v1033_v28  ;;  %v1019_v39 = vld [vmem:[#allocation8 + $0x8] sm:$0xff]  ;;  %v1018_v41 = vld [vmem:[#allocation8] sm:$0xff]  ;;  %v1029_v43 = vld [vmem:[#allocation8 + $0x58] sm:$0xff]  ;;  %s723_s14 = scalar_lea.sflag [#allocation4], %s1542_s4  ;;  %s1298_s20 = sshra.s32 %s738_s2, 4  ;;  %s1299_s20 = int_to_ptr.hbm [resolvable:$true] %s1298_s20 }
  0x5b   : > { %v1031_v40 = vld [vmem:[#allocation8 + $0x68] sm:$0xff]  ;;  %v1030_v42 = vld [vmem:[#allocation8 + $0x60] sm:$0xff]  ;;  %v1028_v44 = vld [vmem:[#allocation8 + $0x50] sm:$0xff]  ;;  %s1300_s29 = scalar_lea.hbm %s1299_s20, 8  ;;  %s1304_s9 = scalar_lea.hbm %s1615_s7, 24 }
  0x5c   : > { %617 = vmatpush.bf16.msra.mxu2 %v1024_v29  ;;  %v1027_v45 = vld [vmem:[#allocation8 + $0x48] sm:$0xff]  ;;  %v1026_v46 = vld [vmem:[#allocation8 + $0x40] sm:$0xff]  ;;  %v1041_v47 = vld [vmem:[#allocation10 + $0x38] sm:$0xff]  ;;  %p1301_p1 = scmp.ne.s32.totalorder %s1299_s20, %s1300_s29  ;;  %p1305_p5 = scmp.lt.s32.totalorder %s1299_s20, %s1615_s7 }
  0x5d   : > { %460 = vmatpush.bf16.msra.mxu1 %v887_v10  ;;  %v404_v48 = vld [vmem:[%s1611_s3] sm:$0x3]  ;;  %708 = vmatpush.bf16.msra.mxu0 %v1041_v47  ;;  %v1040_v49 = vld [vmem:[#allocation10 + $0x30] sm:$0xff]  ;;  %v1039_v62 = vld [vmem:[#allocation10 + $0x28] sm:$0xff]  ;;  %p1306_p7 = scmp.lt.s32.totalorder %s1304_s9, %s1300_s29 }
  0x5e   : > { %630 = vmatpush.bf16.msra.mxu3 %v1032_v30  ;;  %v1133_v32 = vpop.eup %1132  ;;  %v406_v50 = vperm.slane %v404_v48, 0  ;;  %v407_v56 = vperm.slane %v404_v48, 1  ;;  %v1038_v63 = vld [vmem:[#allocation10 + $0x20] sm:$0xff]  ;;  %v1037_v0 = vld [vmem:[#allocation10 + $0x18] sm:$0xff]  ;;  %v1036_v1 = vld [vmem:[#allocation10 + $0x10] sm:$0xff]  ;;  %p1302_p3 = pnand %p1301_p1, %p1491_p13 }
  0x5f   : > { %v1035_v2 = vld [vmem:[#allocation10 + $0x8] sm:$0xff]  ;;  %v1034_v3 = vld [vmem:[#allocation10] sm:$0xff]  ;;  %p1307_p6 = por %p1306_p7, %p1305_p5 }
  0x60   : > { %618 = vmatpush.bf16.msra.mxu2 %v1023_v31  ;;  %v1129_v6 = vld [vmem:[%s1613_s5] ss:$0 sm:$0xff]  ;;  %p1303_p12 = pneg %p1302_p3 }
  0x61   : > { %461 = vmatpush.bf16.msra.mxu1 %v879_v13  ;;  %709 = vmatpush.bf16.msra.mxu0 %v1040_v49 }
  0x62   : > { %631 = vmatpush.bf16.msra.mxu3 %v1031_v40  ;;  %p1308_p8 = pnand %p1307_p6, %p1303_p12 }
  0x64   : > { %619 = vmatpush.bf16.msra.mxu2 %v1022_v33 }
  0x65   : > { %471 = vmatpush.bf16.msrb.mxu1 %v907_v16  ;;  %710 = vmatpush.bf16.msra.mxu0 %v1039_v62 }
  0x66   : > { %632 = vmatpush.bf16.msra.mxu3 %v1030_v42 }
  0x68   : > { %620 = vmatpush.bf16.msra.mxu2 %v1021_v37 }
  0x69   : > { %472 = vmatpush.bf16.msrb.mxu1 %v899_v19  ;;  %711 = vmatpush.bf16.msra.mxu0 %v1038_v63 }
  0x6a   : > { %633 = vmatpush.bf16.msra.mxu3 %v1029_v43 }
  0x6c   : > { %621 = vmatpush.bf16.msra.mxu2 %v1020_v38 }
  0x6d   : > { %473 = vmatpush.bf16.msrb.mxu1 %v891_v22  ;;  %712 = vmatpush.bf16.msra.mxu0 %v1037_v0 }
  0x6e   : > { %634 = vmatpush.bf16.msra.mxu3 %v1028_v44 }
  0x70   : > { %622 = vmatpush.bf16.msra.mxu2 %v1019_v39 }
  0x71   : > { %474 = vmatpush.bf16.msrb.mxu1 %v883_v25  ;;  %713 = vmatpush.bf16.msra.mxu0 %v1036_v1 }
  0x72   : > { %635 = vmatpush.bf16.msra.mxu3 %v1027_v45 }
  0x74   : > { %623 = vmatpush.bf16.msra.mxu2 %v1018_v41 }
  0x75   : > { %714 = vmatpush.bf16.msra.mxu0 %v1035_v2 }
  0x76   : > { %636 = vmatpush.bf16.msra.mxu3 %v1026_v46 }
  0x79   : > { %715 = vmatpush.bf16.msra.mxu0 %v1034_v3 }
  0xcb   : > { %v391_v34 = vpop.permute.xlu0 %390 }
  0xcc   : > { %v394_v35 = vsel %vm393_vm0, %v1133_v32, %v391_v34 }
  0xcd   : > { %v395_v36 = vpack.c.bf16 %v394_v35, %v394_v35 }
  0xcf   : > { %908 = vmatmul.msk.bf16.vlgmr.msra.gmra.mxu1 %vm450_vm1, %v395_v36 }
  0xdf   : > { %909 = vmatmul.msk.bf16.vlgmr.msrb.gmra.mxu1 %vm450_vm1, %v395_v36 }
 0x14c   : > { %v463_v51 = vpop.f32.mrf.mxu1 }
 0x14d   : > { %v464_v52 = vadd.f32 %v463_v51, %v406_v50 }
 0x14f   : > { %v480_v53 = vmax.f32 %v464_v52, 0.0 }
 0x151   : > { %v482_v54 = vpack.c.bf16 %v480_v53, %v480_v53 }
 0x153   : > { %624 = vmatmul.bf16.vlgmr.msra.gmra.mxu2 %v482_v54 }
 0x154   : > { %v465_v55 = vpop.f32.mrf.mxu1 }
 0x15c   : > { %v476_v57 = vpop.f32.mrf.mxu1 }
 0x15d   : > { %v477_v58 = vadd.f32 %v476_v57, %v407_v56 }
 0x15f   : > { %v481_v59 = vmax.f32 %v477_v58, 0.0 }
 0x161   : > { %v483_v60 = vpack.c.bf16 %v481_v59, %v481_v59 }
 0x163   : > { %637 = vmatmul.bf16.vlgmr.msra.gmra.mxu3 %v483_v60 }
 0x164   : > { %v478_v61 = vpop.f32.mrf.mxu1 }
 0x1d6   : > { %v625_v4 = vpop.f32.mrf.mxu2 }
 0x1d7   : > { %v626_v7 = vadd.f32 %v1129_v6, %v625_v4 }
 0x1de   : > { %v627_v5 = vpop.f32.mrf.mxu2 }
 0x1e6   : > { %v638_v8 = vpop.f32.mrf.mxu3 }
 0x1e7   : > { %v639_v9 = vadd.f32 %v638_v8, %v626_v7 }
 0x1e9   : > { %v642_v10 = vmax.f32 %v639_v9, 0.0 }
 0x1eb   : > { %v643_v11 = vpack.c.bf16 %v642_v10, %v642_v10 }
 0x1ed   : > { %716 = vmatmul.bf16.vlgmr.msra.gmra.mxu0 %v643_v11 }
 0x1ee   : > { %v640_v12 = vpop.f32.mrf.mxu3 }
 0x26a   : > { %v717_v13 = vpop.f32.mrf.mxu0 }
 0x26b   : > { %721 = vst [vmem:[%s383_s23] sm:$0xff] %v717_v13 }
 0x26c   : > { %1311 = shalt.err (!%p1308_p8)
}
 0x26d   : > { %1058 = dma.vmem_to_hbm [thread:$0]  (%p1491_p13), %s736_s10, 128, %s738_s2, %s723_s14  }
 0x272   : > { %v719_v14 = vpop.f32.mrf.mxu0 }
 0x273 PF: > { %p1088_p10 = scmp.ge.s32.totalorder %s1362_s27, 2  ;;  %s749_s4 = sand.u32 1, %s1350_s24  }
 0x274   : > { %s750_s15 = scalar_lea.sflag [#allocation4], %s749_s4 }
 0x275   : > { %p1078_p9 = pnand %p1088_p10, %p1497_p4 }
 0x277   : > { %p1079_p11 = pneg %p1078_p9 }
 0x279   : > { %1345 = dma.done.wait (%p1079_p11), %s750_s15, 128  }
 0x27a   : > { %1347 = vsyncadd (%p1079_p11), %s750_s15, 4294967168  ;;  %s1635_s27 = sld [smem:[#allocation18_spill]]  ;;  %s1638_s24 = smov %s1354_s25 }
 0x27b   : > { %s1636_s12 = sld [smem:[#allocation17_spill]] }
 0x27c   : > { %s1637_s26 = sld [smem:[#allocation19_spill]] }
 0x280   : > { %p24_p0 = scmp.ge.s32.totalorder %s1635_s27, 5  }
 0x281   : > { %s1639_s25 = smov %s1636_s12 }
 0x282   :  { %26 = sbr.rel (!%p24_p0) target bundleno = 12 (0xc), region = 118 }
 0x287   :  { %756 = vsyncpa [#allocation3], 1 }
 0x288   :  { %758 = vsyncpa [#allocation3 + $0x1], 1 }
 0x289   :  { %759 = vsyncpa [#allocation6], 1 }
 0x28a   :  { %761 = vsyncpa [#allocation6 + $0x1], 1 }
 0x28b   :  { %762 = vsyncpa [#allocation9], 1 }
 0x28c   :  { %763 = vsyncpa [#allocation4], 1 }
 0x28d   :  { %765 = vsyncpa [#allocation4 + $0x1], 1 }

// kernel: tpu_custom_call.1
= control target key start
LH: loop header
LB: loop body
LE: loop exit
PB: predicated region body
PF: predicated region fallthrough
CT: control target
= control target key end

     0   :  { %s1608_s0 = inlined_call_operand.hbm [shape: f32[24,32], index: 0, kind: input, shape index: {}]   ;;  %s1609_s1 = inlined_call_operand.hbm [shape: f32[24,32], index: 1, kind: input, shape index: {}]   ;;  %s1610_s2 = inlined_call_operand.hbm [shape: bf16[64,256], index: 2, kind: input, shape index: {}]   ;;  %s1611_s3 = inlined_call_operand.vmem [shape: f32[1,256], index: 3, kind: input, shape index: {}]   ;;  %s1612_s4 = inlined_call_operand.hbm [shape: bf16[256,128], index: 4, kind: input, shape index: {}]   ;;  %s1613_s5 = inlined_call_operand.vmem [shape: f32[1,128], index: 5, kind: input, shape index: {}]   ;;  %s1614_s6 = inlined_call_operand.hbm [shape: bf16[128,128], index: 6, kind: input, shape index: {}]   ;;  %s1615_s7 = inlined_call_operand.hbm [shape: f32[24,128], index: 7, kind: output, shape index: {}]  }
   0x1   :  { %1619 = sst [smem:[#allocation20_spill]] %s1610_s2 }
   0x2   :  { %1620 = sst [smem:[#allocation21_spill]] %s1612_s4 }
   0x3   :  { %1621 = sst [smem:[#allocation22_spill]] %s1614_s6 }
   0x4   :  { %12 = vsyncpa [#allocation3], 0 }
   0x5   :  { %14 = vsyncpa [#allocation3 + $0x1], 0 }
   0x6   :  { %15 = vsyncpa [#allocation6], 0 }
   0x7   :  { %17 = vsyncpa [#allocation6 + $0x1], 0 }
   0x8   :  { %18 = vsyncpa [#allocation9], 0 }
   0x9   :  { %19 = vsyncpa [#allocation4], 0 }
   0xa   :  { %21 = vsyncpa [#allocation4 + $0x1], 0  ;;  %s1412_s24 = smov 0   ;;  %s1414_s25 = smov 0  }
   0xb   :  { %s1416_s26 = smov 0   ;;  %s1418_s27 = smov 0  }
   0xc LB: > { %1622 = sst [smem:[#allocation17_spill]] %s1358_s26  ;;  %s1436_s8 = sadd.s32 4294967295, %s1362_s27   ;;  %s1362_s27 = sphi %s1418_s27, %s1635_s27   ;;  %s1358_s26 = sphi %s1416_s26, %s1637_s26   ;;  %s1354_s25 = sphi %s1414_s25, %s1639_s25   ;;  %s1350_s24 = sphi %s1412_s24, %s1638_s24  }
   0xd   : > { %s1623_s2 = sld [smem:[#allocation20_spill]]  ;;  %p860_p0 = scmp.ge.s32.totalorder %s1362_s27, 1 }
   0xe   : > { %p48_p1 = scmp.eq.s32.totalorder %s1436_s8, 0  ;;  %p215_p2 = scmp.lt.s32.totalorder %s1362_s27, 4 }
   0xf   : > { %s1364_s10 = smov [#allocation7]   ;;  %s1625_s4 = sld [smem:[#allocation21_spill]] }
  0x10   : > { %p1441_p3 = pnand %p860_p0, %p215_p2  ;;  %s228_s11 = sshll.u32 %s1364_s10, 4  ;;  %s229_s11 = int_to_ptr.vmem [resolvable:$true] %s228_s11 }
  0x11   : > { %s1365_s16 = smov [#allocation8]   ;;  %s1366_s18 = smov 128  }
  0x12   : > { %p1060_p4 = pneg %p1441_p3  ;;  %s245_s17 = sshll.u32 %s1365_s16, 4  ;;  %s246_s17 = int_to_ptr.vmem [resolvable:$true] %s245_s17 }
  0x13   : > { %s226_s30 = sshll.u32 %s1623_s2, 4  ;;  %s1367_s19 = smov 8   ;;  %s227_s30 = int_to_ptr.hbm [resolvable:$true] %s226_s30 }
  0x14   : > { %p1452_p5 = pnand %p1060_p4, %p48_p1  ;;  %s1368_s20 = smov 64  }
  0x15   : > { %s243_s14 = sshll.u32 %s1625_s4, 4  ;;  %s1369_s21 = smov 4   ;;  %s244_s14 = int_to_ptr.hbm [resolvable:$true] %s243_s14 }
  0x16   : > { %1063 = dma.hbm_to_vmem [thread:$0]  (!%p1452_p5), %s227_s30, 1024, %s229_s11, [#allocation6], %s1366_s18, %s1366_s18, %s1367_s19  }
  0x17   : > { %1066 = dma.hbm_to_vmem [thread:$0]  (!%p1452_p5), %s244_s14, 2048, %s246_s17, [#allocation9], %s1368_s20, %s1368_s20, %s1369_s21  }
  0x18   : > { %s1627_s6 = sld [smem:[#allocation22_spill]]  ;;  %s1370_s29 = smov [#allocation10]  }
  0x19   : > { %s262_s10 = sshll.u32 %s1370_s29, 4  ;;  %s859_s30 = sadd.s32 4294967294, %s1362_s27   ;;  %s263_s10 = int_to_ptr.vmem [resolvable:$true] %s262_s10 }
  0x1a   : > { %s1467_s11 = sadd.s32 1, %s1362_s27   ;;  %s34_s12 = sadd.s32 1, %s1358_s26 }
  0x1b   : > { %1628 = sst [smem:[#allocation18_spill]] %s1467_s11  ;;  %s31_s13 = ssub.s32 %s1362_s27, %s1467_s11 }
  0x1c   : > { %p41_p6 = scmp.ne.s32.totalorder %s1358_s26, %s1354_s25  ;;  %p32_p7 = scmp.eq.s32.totalorder %s31_s13, 0 }
  0x1d   : > { %p42_p8 = scmp.eq.s32.totalorder %s1362_s27, 0  ;;  %p47_p9 = scmp.ne.s32.totalorder %s1354_s25, %s1350_s24 }
  0x1e   : > { %s260_s28 = sshll.u32 %s1627_s6, 4  ;;  %p202_p10 = scmp.eq.s32.totalorder %s1436_s8, 2  ;;  %s261_s28 = int_to_ptr.hbm [resolvable:$true] %s260_s28 }
  0x1f   : > { %1069 = dma.hbm_to_vmem [thread:$0]  (!%p1452_p5), %s261_s28, 1024, %s263_s10, [#allocation9], %s1368_s20, %s1368_s20, %s1369_s21  }
  0x20   : > { %s1479_s14 = scalar_select %p32_p7, %s1358_s26, %s34_s12  }
  0x21   : > { %p1481_p11 = por %p42_p8, %p41_p6  ;;  %p1487_p12 = por %p48_p1, %p47_p9 }
  0x22   : > { %1629 = sst [smem:[#allocation19_spill]] %s1479_s14  ;;  %p1491_p13 = por %p202_p10, %p41_p6 }
  0x23   : > { %p208_p0 = scmp.eq.s32.totalorder %s859_s30, 2  ;;  %p1084_p2 = scmp.lt.s32.totalorder %s1362_s27, 3 }
  0x24   : > { %s276_s18 = sand.u32 1, %s1358_s26   ;;  %s866_s21 = sshll.u32 %s1362_s27, 3 }
  0x25   : > { %p1497_p4 = por %p208_p0, %p47_p9  ;;  %s865_s20 = sshll.u32 %s276_s18, 3 }
  0x26   : > { %s284_s28 = scalar_lea.hbm %s1608_s0, %s866_s21  ;;  %s280_s10 = scalar_lea.vmem [#allocation2], %s865_s20 }
  0x27   : > { %s286_s29 = sshll.u32 %s284_s28, 4  ;;  %s288_s12 = sshll.u32 %s280_s10, 4  ;;  %s287_s29 = int_to_ptr.hbm [resolvable:$true] %s286_s29  ;;  %s289_s12 = int_to_ptr.vmem [resolvable:$true] %s288_s12 }
  0x28   : > { %p1507_p5 = pnand %p1084_p2, %p1481_p11  ;;  %s303_s4 = scalar_lea.hbm %s1609_s1, %s866_s21 }
  0x29   : > { %s295_s6 = sand.u32 1, %s1362_s27   ;;  %s277_s14 = scalar_lea.sflag [#allocation3], %s276_s18 }
  0x2a   : > { %s1224_s22 = sshra.s32 %s287_s29, 4  ;;  %p1228_p7 = pneg %p1507_p5  ;;  %s1225_s22 = int_to_ptr.hbm [resolvable:$true] %s1224_s22 }
  0x2b   : > { %s1226_s23 = scalar_lea.hbm %s1225_s22, 8  ;;  %s1231_s10 = scalar_lea.hbm %s1608_s0, 24 }
  0x2c   : > { %p1227_p6 = scmp.ne.s32.totalorder %s1225_s22, %s1226_s23  ;;  %p1232_p10 = scmp.lt.s32.totalorder %s1225_s22, %s1608_s0 }
  0x2d   : > { %p1233_p11 = scmp.lt.s32.totalorder %s1231_s10, %s1226_s23 }
  0x2e   : > { %p1229_p8 = pnand %p1228_p7, %p1227_p6 }
  0x2f   : > { %p1234_p0 = por %p1233_p11, %p1232_p10 }
  0x30   : > { %p1230_p9 = pneg %p1229_p8 }
  0x32   : > { %p1235_p2 = pnand %p1234_p0, %p1230_p9 }
  0x34   : > { %1238 = shalt.err (!%p1235_p2)
}
  0x35   : > { %1073 = dma.hbm_to_vmem [thread:$0]  (!%p1507_p5), %s287_s29, 128, %s289_s12, %s277_s14  }
  0x36   : > { %s305_s18 = sshll.u32 %s303_s4, 4  ;;  %s299_s21 = scalar_lea.vmem [#allocation5], %s865_s20  ;;  %s306_s18 = int_to_ptr.hbm [resolvable:$true] %s305_s18 }
  0x37   : > { %s307_s26 = sshll.u32 %s299_s21, 4  ;;  %s296_s11 = scalar_lea.sflag [#allocation6], %s295_s6  ;;  %s308_s26 = int_to_ptr.vmem [resolvable:$true] %s307_s26 }
  0x38   : > { %s1254_s16 = sshra.s32 %s306_s18, 4  ;;  %s1261_s10 = scalar_lea.hbm %s1609_s1, 24  ;;  %s1255_s16 = int_to_ptr.hbm [resolvable:$true] %s1254_s16 }
  0x39   : > { %s1256_s28 = scalar_lea.hbm %s1255_s16, 8  ;;  %p1262_p9 = scmp.lt.s32.totalorder %s1255_s16, %s1609_s1 }
  0x3a   : > { %p1257_p6 = scmp.ne.s32.totalorder %s1255_s16, %s1256_s28  ;;  %p1263_p11 = scmp.lt.s32.totalorder %s1261_s10, %s1256_s28 }
  0x3c   : > { %p1259_p8 = pnand %p1257_p6, %p1228_p7  ;;  %p1264_p0 = por %p1263_p11, %p1262_p9 }
  0x3e   : > { %p1260_p10 = pneg %p1259_p8 }
  0x40   : > { %p1265_p2 = pnand %p1264_p0, %p1260_p10 }
  0x42   : > { %1268 = shalt.err (!%p1265_p2)
}
  0x43   : > { %1076 = dma.hbm_to_vmem [thread:$0]  (!%p1507_p5), %s306_s18, 128, %s308_s26, %s296_s11  }
  0x44   : > { %316 = sbr.rel (%p1441_p3) target bundleno = 627 (0x273), region = 48  ;;  %s1542_s4 = sand.u32 (!%p1441_p3), 1, %s1354_s25  }
  0x45   : > { %s1545_s6 = sshll.u32 (!%p1441_p3), %s1542_s4, 3  ;;  %s319_s20 = scalar_lea.sflag (!%p1441_p3), [#allocation3], %s1542_s4 }
  0x46   : > { %s322_s29 = scalar_lea.vmem (!%p1441_p3), [#allocation2], %s1545_s6 }
  0x49   : > { %1329 = dma.done.wait (%p1487_p12), %s319_s20, 128  }
  0x4a   : > { %1331 = vsyncadd (%p1487_p12), %s319_s20, 4294967168  ;;  %s328_s26 = sand.u32 1, %s1436_s8   ;;  %s332_s11 = scalar_lea.vmem [#allocation5], %s1545_s6 }
  0x4b   : > { %s329_s9 = scalar_lea.sflag [#allocation6], %s328_s26 }
  0x4c   : > { %1333 = dma.done.wait (%p1487_p12), %s329_s9, 128  }
  0x4d   : > { %1335 = vsyncadd (%p1487_p12), %s329_s9, 4294967168 }
  0x4e   : > { %1337 = dma.done.wait (%p48_p1), [#allocation6], 1024  }
  0x4f   : > { %1339 = vsyncadd (%p48_p1), [#allocation6], 4294966272 }
  0x50   : > { %1341 = dma.done.wait (%p48_p1), [#allocation9], 3072  }
  0x51   : > { %1343 = vsyncadd (%p48_p1), [#allocation9], 4294964224  ;;  %v387_v0 = vld [vmem:[%s332_s11] sm:$0xff]  ;;  %v894_v4 = vld [vmem:[#allocation7 + $0x20] sm:$0xf]  ;;  %s1371_s15 = smov 32  }
  0x52   : > { %v902_v1 = vld [vmem:[#allocation7 + $0x30] sm:$0xf]  ;;  %v1017_v2 = vld [vmem:[#allocation7 + $0x34] sm:$0xf0]  ;;  %1130 = vtanh.f32 %v387_v0  ;;  %v1015_v5 = vld [vmem:[#allocation7 + $0x24] sm:$0xf0] }
  0x53   : > { %v903_v3 = vor.u32 %v1017_v2, %v902_v1  ;;  %v895_v6 = vor.u32 %v1015_v5, %v894_v4  ;;  %v886_v7 = vld [vmem:[#allocation7 + $0x10] sm:$0xf]  ;;  %v1013_v8 = vld [vmem:[#allocation7 + $0x14] sm:$0xf0]  ;;  %v878_v11 = vld [vmem:[#allocation7] sm:$0xf] }
  0x54   : > { %v887_v10 = vor.u32 %v1013_v8, %v886_v7  ;;  %v1011_v12 = vld [vmem:[#allocation7 + $0x4] sm:$0xf0]  ;;  %v1016_v14 = vld [vmem:[#allocation7 + $0x34] sm:$0xf]  ;;  %v904_v15 = vld [vmem:[#allocation7 + $0x38] sm:$0xf0] }
  0x55   : > { %458 = vmatpush.bf16.msra.mxu1 %v903_v3  ;;  %v879_v13 = vor.u32 %v1011_v12, %v878_v11  ;;  %v907_v16 = vor.u32 %v1016_v14, %v904_v15  ;;  %v1014_v17 = vld [vmem:[#allocation7 + $0x24] sm:$0xf]  ;;  %v896_v18 = vld [vmem:[#allocation7 + $0x28] sm:$0xf0]  ;;  %v1012_v20 = vld [vmem:[#allocation7 + $0x14] sm:$0xf] }
  0x56   : > { %v899_v19 = vor.u32 %v1014_v17, %v896_v18  ;;  %v888_v21 = vld [vmem:[#allocation7 + $0x18] sm:$0xf0]  ;;  %v1010_v23 = vld [vmem:[#allocation7 + $0x4] sm:$0xf]  ;;  %v880_v24 = vld [vmem:[#allocation7 + $0x8] sm:$0xf0] }
  0x57   : > { %v891_v22 = vor.u32 %v1012_v20, %v888_v21  ;;  %v883_v25 = vor.u32 %v1010_v23, %v880_v24  ;;  %v1025_v26 = vld [vmem:[#allocation8 + $0x38] sm:$0xff]  ;;  %v385_v27 = vld [vmem:[%s322_s29] sm:$0xff]  ;;  %v1024_v29 = vld [vmem:[#allocation8 + $0x30] sm:$0xff]  ;;  %vm393_vm0 = vcmask 261120   ;;  %vm450_vm1 = vcmask 523264   ;;  %s1007_s21 = sshll.u32 %s1436_s8, 3 }
  0x58   : > { %v1131_v9 = vpop.eup %1130  ;;  %v1033_v28 = vld [vmem:[#allocation8 + $0x78] sm:$0xff]  ;;  %616 = vmatpush.bf16.msra.mxu2 %v1025_v26  ;;  %v1032_v30 = vld [vmem:[#allocation8 + $0x70] sm:$0xff]  ;;  %1132 = vtanh.f32 %v385_v27  ;;  %v1023_v31 = vld [vmem:[#allocation8 + $0x28] sm:$0xff]  ;;  %s733_s22 = scalar_lea.hbm %s1615_s7, %s1007_s21  ;;  %s383_s23 = scalar_lea.vmem [#allocation11], %s1545_s6 }
  0x59   : > { %459 = vmatpush.bf16.msra.mxu1 %v895_v6  ;;  %390 = vrot.lane.b32.xlu0 %v1131_v9, %s1371_s15  ;;  %v1022_v33 = vld [vmem:[#allocation8 + $0x20] sm:$0xff]  ;;  %v1021_v37 = vld [vmem:[#allocation8 + $0x18] sm:$0xff]  ;;  %v1020_v38 = vld [vmem:[#allocation8 + $0x10] sm:$0xff]  ;;  %s735_s10 = sshll.u32 %s383_s23, 4  ;;  %s737_s2 = sshll.u32 %s733_s22, 4  ;;  %s736_s10 = int_to_ptr.vmem [resolvable:$true] %s735_s10  ;;  %s738_s2 = int_to_ptr.hbm [resolvable:$true] %s737_s2 }
  0x5a   : > { %629 = vmatpush.bf16.msra.mxu3 %v1033_v28  ;;  %v1019_v39 = vld [vmem:[#allocation8 + $0x8] sm:$0xff]  ;;  %v1018_v41 = vld [vmem:[#allocation8] sm:$0xff]  ;;  %v1029_v43 = vld [vmem:[#allocation8 + $0x58] sm:$0xff]  ;;  %s723_s14 = scalar_lea.sflag [#allocation4], %s1542_s4  ;;  %s1298_s20 = sshra.s32 %s738_s2, 4  ;;  %s1299_s20 = int_to_ptr.hbm [resolvable:$true] %s1298_s20 }
  0x5b   : > { %v1031_v40 = vld [vmem:[#allocation8 + $0x68] sm:$0xff]  ;;  %v1030_v42 = vld [vmem:[#allocation8 + $0x60] sm:$0xff]  ;;  %v1028_v44 = vld [vmem:[#allocation8 + $0x50] sm:$0xff]  ;;  %s1300_s29 = scalar_lea.hbm %s1299_s20, 8  ;;  %s1304_s9 = scalar_lea.hbm %s1615_s7, 24 }
  0x5c   : > { %617 = vmatpush.bf16.msra.mxu2 %v1024_v29  ;;  %v1027_v45 = vld [vmem:[#allocation8 + $0x48] sm:$0xff]  ;;  %v1026_v46 = vld [vmem:[#allocation8 + $0x40] sm:$0xff]  ;;  %v1041_v47 = vld [vmem:[#allocation10 + $0x38] sm:$0xff]  ;;  %p1301_p1 = scmp.ne.s32.totalorder %s1299_s20, %s1300_s29  ;;  %p1305_p5 = scmp.lt.s32.totalorder %s1299_s20, %s1615_s7 }
  0x5d   : > { %460 = vmatpush.bf16.msra.mxu1 %v887_v10  ;;  %v404_v48 = vld [vmem:[%s1611_s3] sm:$0x3]  ;;  %708 = vmatpush.bf16.msra.mxu0 %v1041_v47  ;;  %v1040_v49 = vld [vmem:[#allocation10 + $0x30] sm:$0xff]  ;;  %v1039_v62 = vld [vmem:[#allocation10 + $0x28] sm:$0xff]  ;;  %p1306_p7 = scmp.lt.s32.totalorder %s1304_s9, %s1300_s29 }
  0x5e   : > { %630 = vmatpush.bf16.msra.mxu3 %v1032_v30  ;;  %v1133_v32 = vpop.eup %1132  ;;  %v406_v50 = vperm.slane %v404_v48, 0  ;;  %v407_v56 = vperm.slane %v404_v48, 1  ;;  %v1038_v63 = vld [vmem:[#allocation10 + $0x20] sm:$0xff]  ;;  %v1037_v0 = vld [vmem:[#allocation10 + $0x18] sm:$0xff]  ;;  %v1036_v1 = vld [vmem:[#allocation10 + $0x10] sm:$0xff]  ;;  %p1302_p3 = pnand %p1301_p1, %p1491_p13 }
  0x5f   : > { %v1035_v2 = vld [vmem:[#allocation10 + $0x8] sm:$0xff]  ;;  %v1034_v3 = vld [vmem:[#allocation10] sm:$0xff]  ;;  %p1307_p6 = por %p1306_p7, %p1305_p5 }
  0x60   : > { %618 = vmatpush.bf16.msra.mxu2 %v1023_v31  ;;  %v1129_v6 = vld [vmem:[%s1613_s5] ss:$0 sm:$0xff]  ;;  %p1303_p12 = pneg %p1302_p3 }
  0x61   : > { %461 = vmatpush.bf16.msra.mxu1 %v879_v13  ;;  %709 = vmatpush.bf16.msra.mxu0 %v1040_v49 }
  0x62   : > { %631 = vmatpush.bf16.msra.mxu3 %v1031_v40  ;;  %p1308_p8 = pnand %p1307_p6, %p1303_p12 }
  0x64   : > { %619 = vmatpush.bf16.msra.mxu2 %v1022_v33 }
  0x65   : > { %471 = vmatpush.bf16.msrb.mxu1 %v907_v16  ;;  %710 = vmatpush.bf16.msra.mxu0 %v1039_v62 }
  0x66   : > { %632 = vmatpush.bf16.msra.mxu3 %v1030_v42 }
  0x68   : > { %620 = vmatpush.bf16.msra.mxu2 %v1021_v37 }
  0x69   : > { %472 = vmatpush.bf16.msrb.mxu1 %v899_v19  ;;  %711 = vmatpush.bf16.msra.mxu0 %v1038_v63 }
  0x6a   : > { %633 = vmatpush.bf16.msra.mxu3 %v1029_v43 }
  0x6c   : > { %621 = vmatpush.bf16.msra.mxu2 %v1020_v38 }
  0x6d   : > { %473 = vmatpush.bf16.msrb.mxu1 %v891_v22  ;;  %712 = vmatpush.bf16.msra.mxu0 %v1037_v0 }
  0x6e   : > { %634 = vmatpush.bf16.msra.mxu3 %v1028_v44 }
  0x70   : > { %622 = vmatpush.bf16.msra.mxu2 %v1019_v39 }
  0x71   : > { %474 = vmatpush.bf16.msrb.mxu1 %v883_v25  ;;  %713 = vmatpush.bf16.msra.mxu0 %v1036_v1 }
  0x72   : > { %635 = vmatpush.bf16.msra.mxu3 %v1027_v45 }
  0x74   : > { %623 = vmatpush.bf16.msra.mxu2 %v1018_v41 }
  0x75   : > { %714 = vmatpush.bf16.msra.mxu0 %v1035_v2 }
  0x76   : > { %636 = vmatpush.bf16.msra.mxu3 %v1026_v46 }
  0x79   : > { %715 = vmatpush.bf16.msra.mxu0 %v1034_v3 }
  0xcb   : > { %v391_v34 = vpop.permute.xlu0 %390 }
  0xcc   : > { %v394_v35 = vsel %vm393_vm0, %v1133_v32, %v391_v34 }
  0xcd   : > { %v395_v36 = vpack.c.bf16 %v394_v35, %v394_v35 }
  0xcf   : > { %908 = vmatmul.msk.bf16.vlgmr.msra.gmra.mxu1 %vm450_vm1, %v395_v36 }
  0xdf   : > { %909 = vmatmul.msk.bf16.vlgmr.msrb.gmra.mxu1 %vm450_vm1, %v395_v36 }
 0x14c   : > { %v463_v51 = vpop.f32.mrf.mxu1 }
 0x14d   : > { %v464_v52 = vadd.f32 %v463_v51, %v406_v50 }
 0x14f   : > { %v480_v53 = vmax.f32 %v464_v52, 0.0 }
 0x151   : > { %v482_v54 = vpack.c.bf16 %v480_v53, %v480_v53 }
 0x153   : > { %624 = vmatmul.bf16.vlgmr.msra.gmra.mxu2 %v482_v54 }
 0x154   : > { %v465_v55 = vpop.f32.mrf.mxu1 }
 0x15c   : > { %v476_v57 = vpop.f32.mrf.mxu1 }
 0x15d   : > { %v477_v58 = vadd.f32 %v476_v57, %v407_v56 }
 0x15f   : > { %v481_v59 = vmax.f32 %v477_v58, 0.0 }
 0x161   : > { %v483_v60 = vpack.c.bf16 %v481_v59, %v481_v59 }
 0x163   : > { %637 = vmatmul.bf16.vlgmr.msra.gmra.mxu3 %v483_v60 }
 0x164   : > { %v478_v61 = vpop.f32.mrf.mxu1 }
 0x1d6   : > { %v625_v4 = vpop.f32.mrf.mxu2 }
 0x1d7   : > { %v626_v7 = vadd.f32 %v1129_v6, %v625_v4 }
 0x1de   : > { %v627_v5 = vpop.f32.mrf.mxu2 }
 0x1e6   : > { %v638_v8 = vpop.f32.mrf.mxu3 }
 0x1e7   : > { %v639_v9 = vadd.f32 %v638_v8, %v626_v7 }
 0x1e9   : > { %v642_v10 = vmax.f32 %v639_v9, 0.0 }
 0x1eb   : > { %v643_v11 = vpack.c.bf16 %v642_v10, %v642_v10 }
 0x1ed   : > { %716 = vmatmul.bf16.vlgmr.msra.gmra.mxu0 %v643_v11 }
 0x1ee   : > { %v640_v12 = vpop.f32.mrf.mxu3 }
 0x26a   : > { %v717_v13 = vpop.f32.mrf.mxu0 }
 0x26b   : > { %721 = vst [vmem:[%s383_s23] sm:$0xff] %v717_v13 }
 0x26c   : > { %1311 = shalt.err (!%p1308_p8)
}
 0x26d   : > { %1058 = dma.vmem_to_hbm [thread:$0]  (%p1491_p13), %s736_s10, 128, %s738_s2, %s723_s14  }
 0x272   : > { %v719_v14 = vpop.f32.mrf.mxu0 }
 0x273 PF: > { %p1088_p10 = scmp.ge.s32.totalorder %s1362_s27, 2  ;;  %s749_s4 = sand.u32 1, %s1350_s24  }
 0x274   : > { %s750_s15 = scalar_lea.sflag [#allocation4], %s749_s4 }
 0x275   : > { %p1078_p9 = pnand %p1088_p10, %p1497_p4 }
 0x277   : > { %p1079_p11 = pneg %p1078_p9 }
 0x279   : > { %1345 = dma.done.wait (%p1079_p11), %s750_s15, 128  }
 0x27a   : > { %1347 = vsyncadd (%p1079_p11), %s750_s15, 4294967168  ;;  %s1635_s27 = sld [smem:[#allocation18_spill]]  ;;  %s1638_s24 = smov %s1354_s25 }
 0x27b   : > { %s1636_s12 = sld [smem:[#allocation17_spill]] }
 0x27c   : > { %s1637_s26 = sld [smem:[#allocation19_spill]] }
 0x280   : > { %p24_p0 = scmp.ge.s32.totalorder %s1635_s27, 5  }
 0x281   : > { %s1639_s25 = smov %s1636_s12 }
 0x282   :  { %26 = sbr.rel (!%p24_p0) target bundleno = 12 (0xc), region = 118 }
 0x287   :  { %756 = vsyncpa [#allocation3], 1 }
 0x288   :  { %758 = vsyncpa [#allocation3 + $0x1], 1 }
 0x289   :  { %759 = vsyncpa [#allocation6], 1 }
 0x28a   :  { %761 = vsyncpa [#allocation6 + $0x1], 1 }
 0x28b   :  { %762 = vsyncpa [#allocation9], 1 }
 0x28c   :  { %763 = vsyncpa [#allocation4], 1 }
 0x28d   :  { %765 = vsyncpa [#allocation4 + $0x1], 1 }

</bundles_post_ra>
